<compile_context>
chip_gen: v7x
topology: tpu7x:2x2x1
jax: 0.10.0
libtpu: 0.0.40
codegen_flags: <defaults>
</compile_context>

<pallas_src>
import functools

import jax
import jax.numpy as jnp
from jax.experimental import pallas as pl
from jax.experimental.pallas import tpu as pltpu


def red_kernel(x_ref, w1_ref, b1_ref, w2_ref, b2_ref, w3_ref, b3_ref, o_ref):
    # Layer 1: [H1p, n_in](bf16) @ [n_in, TB](bf16) -> f32 [H1p, TB]
    h1 = jnp.dot(w1_ref[...], x_ref[...], preferred_element_type=jnp.float32)
    h1 = jax.nn.sigmoid(h1 + b1_ref[...])          # [H1p,1] broadcasts over lanes
    # Layer 2: [8, H1p] @ [H1p, TB] -> [8, TB]   (padded H1p cols of W2 are zero)
    h2 = jnp.dot(w2_ref[...], h1, preferred_element_type=jnp.float32)
    h2 = jax.nn.sigmoid(h2 + b2_ref[...])
    # Layer 3: [1, 8] @ [8, TB] -> lane-dense [1, TB] output
    h3 = jnp.dot(w3_ref[...], h2, preferred_element_type=jnp.float32)
    o_ref[...] = jax.nn.sigmoid(h3 + b3_ref[...]).astype(o_ref.dtype)


@functools.partial(jax.jit, static_argnames=("tile_b", "use_bf16"))
def red_forward(x, params, *, tile_b=1024, use_bf16=True):
    """Forward pass. x: [B, n_entradas] f32, params in PyTorch layout
    (weights [out, in], biases [out]). Returns [B, 1] f32."""
    w1, b1, w2, b2, w3, b3 = params
    B, n_in = x.shape
    H1, H2 = w1.shape[0], w2.shape[0]
    H1P = 64                                   # pad hidden1 52 -> 64 (MXU aligned)

    # ---- wrapper-side layout plumbing (cheap vs the HBM stream of x) ----
    w1p = jnp.zeros((H1P, n_in), jnp.float32).at[:H1].set(w1)
    b1p = jnp.zeros((H1P, 1), jnp.float32).at[:H1, 0].set(b1)
    w2p = jnp.zeros((H2, H1P), jnp.float32).at[:, :H1].set(w2)   # zero padded cols
    b2c = b2.reshape(H2, 1)
    w3c = w3.reshape(1, H2)
    b3c = b3.reshape(1, 1)

    in_dtype = jnp.bfloat16 if use_bf16 else jnp.float32
    w1p = w1p.astype(in_dtype)

    # Feature-major, batch padded to a multiple of the lane tile.
    n_blocks = pl.cdiv(B, tile_b)
    B_pad = n_blocks * tile_b
    xT = jnp.zeros((n_in, B_pad), in_dtype).at[:, :B].set(x.T.astype(in_dtype))

    full = lambda a: pl.BlockSpec(a.shape, lambda i: (0,) * a.ndim)

    out_T = pl.pallas_call(
        red_kernel,
        out_shape=jax.ShapeDtypeStruct((1, B_pad), jnp.float32),
        grid_spec=pltpu.PrefetchScalarGridSpec(
            num_scalar_prefetch=0,
            grid=(n_blocks,),
            in_specs=[
                pl.BlockSpec((n_in, tile_b), lambda i: (0, i)),   # x tile (batch on lanes)
                full(w1p), full(b1p),                              # weights stay resident
                full(w2p), full(b2c),
                full(w3c), full(b3c),
            ],
            out_specs=pl.BlockSpec((1, tile_b), lambda i: (0, i)),
        ),
        compiler_params=pltpu.CompilerParams(
            dimension_semantics=("parallel",),                    # megacore on v7x
        ),
    )(xT, w1p, b1p, w2p, b2c, w3c, b3c)

    return out_T[0, :B].reshape(B, 1)


def init_params(key, n_entradas):
    """PyTorch nn.Linear default init: U[-1/sqrt(fan_in), 1/sqrt(fan_in)].
    Weights stored in PyTorch layout [out_features, in_features], biases [out]."""
    dims = [(n_entradas, 52), (52, 8), (8, 1)]
    params = []
    for fan_in, fan_out in dims:
        key, kw, kb = jax.random.split(key, 3)
        bound = 1.0 / jnp.sqrt(fan_in)
        w = jax.random.uniform(kw, (fan_out, fan_in), jnp.float32, -bound, bound)
        b = jax.random.uniform(kb, (fan_out,), jnp.float32, -bound, bound)
        params += [w, b]
    return tuple(params)


def red_reference(x, params):
    w1, b1, w2, b2, w3, b3 = params
    h1 = jax.nn.sigmoid(x @ w1.T + b1)
    h2 = jax.nn.sigmoid(h1 @ w2.T + b2)
    return jax.nn.sigmoid(h2 @ w3.T + b3)


if __name__ == "__main__":
    key = jax.random.PRNGKey(0)
    n_entradas = 32   # stand-in for x_trainer.shape[1]
    batch = 8

    key, kx = jax.random.split(key)
    x = jax.random.normal(kx, (batch, n_entradas), jnp.float32)
    params = init_params(key, n_entradas)

    ref = red_reference(x, params)

    # f32 path: exact semantics check.
    out_f32 = jax.block_until_ready(red_forward(x, params, use_bf16=False))
    assert out_f32.shape == (batch, 1)
    assert jnp.allclose(out_f32, ref, atol=1e-5, rtol=1e-5), "f32 mismatch vs reference"

    # bf16 input-stream path (production config): looser tolerance from the cast.
    out_bf16 = jax.block_until_ready(red_forward(x, params, use_bf16=True))
    assert out_bf16.shape == (batch, 1)
    assert jnp.allclose(out_bf16, ref, atol=2e-2, rtol=0.0), "bf16 mismatch vs reference"

    print("KERNEL_OK")
</pallas_src>

<mosaic_0001>
module attributes {stable_mosaic.version = 11 : i64} {
  func.func @red_kernel(%arg0: i32, %arg1: memref<32x1024xf32, #tpu.memory_space<vmem>>, %arg2: memref<64x32xf32, #tpu.memory_space<vmem>>, %arg3: memref<64x1xf32, #tpu.memory_space<vmem>>, %arg4: memref<8x64xf32, #tpu.memory_space<vmem>>, %arg5: memref<8x1xf32, #tpu.memory_space<vmem>>, %arg6: memref<1x8xf32, #tpu.memory_space<vmem>>, %arg7: memref<1x1xf32, #tpu.memory_space<vmem>>, %arg8: memref<1x1024xf32, #tpu.memory_space<vmem>>) attributes {dimension_semantics = [#tpu.dimension_semantics<parallel>], iteration_bounds = array<i64: 1>, scalar_prefetch = 0 : i64, scratch_operands = 0 : i64, tpu.core_type = #tpu.core_type<tc>, window_params = [{transform_indices = @transform_0, window_bounds = array<i64: 32, 1024>}, {pipeline_mode = #tpu.pipeline_mode<synchronous>, transform_indices = @transform_1, window_bounds = array<i64: 64, 32>}, {pipeline_mode = #tpu.pipeline_mode<synchronous>, transform_indices = @transform_2, window_bounds = array<i64: 64, 1>}, {pipeline_mode = #tpu.pipeline_mode<synchronous>, transform_indices = @transform_3, window_bounds = array<i64: 8, 64>}, {pipeline_mode = #tpu.pipeline_mode<synchronous>, transform_indices = @transform_4, window_bounds = array<i64: 8, 1>}, {pipeline_mode = #tpu.pipeline_mode<synchronous>, transform_indices = @transform_5, window_bounds = array<i64: 1, 8>}, {pipeline_mode = #tpu.pipeline_mode<synchronous>, transform_indices = @transform_6, window_bounds = array<i64: 1, 1>}, {transform_indices = @transform_7, window_bounds = array<i64: 1, 1024>}]} {
    %c0 = arith.constant 0 : index
    %c0_0 = arith.constant 0 : index
    %0 = vector.load %arg2[%c0, %c0_0] : memref<64x32xf32, #tpu.memory_space<vmem>>, vector<64x32xf32>
    %c0_1 = arith.constant 0 : index
    %c0_2 = arith.constant 0 : index
    %1 = vector.load %arg1[%c0_1, %c0_2] : memref<32x1024xf32, #tpu.memory_space<vmem>>, vector<32x1024xf32>
    %cst = arith.constant dense<0.000000e+00> : vector<64x1024xf32>
    %2 = tpu.matmul %0, %1, %cst {dimension_numbers = #tpu.dot_dimension_numbers<[1], [0], [0], [1], [0, 0, 1, 1], [], []>} : vector<64x32xf32>, vector<32x1024xf32>, vector<64x1024xf32> -> vector<64x1024xf32>
    %c0_3 = arith.constant 0 : index
    %c0_4 = arith.constant 0 : index
    %3 = vector.load %arg3[%c0_3, %c0_4] : memref<64x1xf32, #tpu.memory_space<vmem>>, vector<64x1xf32>
    %4 = vector.broadcast %3 : vector<64x1xf32> to vector<64x1024xf32>
    %5 = arith.addf %2, %4 : vector<64x1024xf32>
    %6 = arith.negf %5 : vector<64x1024xf32>
    %7 = math.exp %6 : vector<64x1024xf32>
    %cst_5 = arith.constant 1.000000e+00 : f32
    %8 = vector.broadcast %cst_5 : f32 to vector<64x1024xf32>
    %9 = arith.addf %8, %7 : vector<64x1024xf32>
    %10 = arith.divf %8, %9 : vector<64x1024xf32>
    %c0_6 = arith.constant 0 : index
    %c0_7 = arith.constant 0 : index
    %11 = vector.load %arg4[%c0_6, %c0_7] : memref<8x64xf32, #tpu.memory_space<vmem>>, vector<8x64xf32>
    %cst_8 = arith.constant dense<0.000000e+00> : vector<8x1024xf32>
    %12 = tpu.matmul %11, %10, %cst_8 {dimension_numbers = #tpu.dot_dimension_numbers<[1], [0], [0], [1], [0, 0, 1, 1], [], []>} : vector<8x64xf32>, vector<64x1024xf32>, vector<8x1024xf32> -> vector<8x1024xf32>
    %c0_9 = arith.constant 0 : index
    %c0_10 = arith.constant 0 : index
    %13 = vector.load %arg5[%c0_9, %c0_10] : memref<8x1xf32, #tpu.memory_space<vmem>>, vector<8x1xf32>
    %14 = vector.broadcast %13 : vector<8x1xf32> to vector<8x1024xf32>
    %15 = arith.addf %12, %14 : vector<8x1024xf32>
    %16 = arith.negf %15 : vector<8x1024xf32>
    %17 = math.exp %16 : vector<8x1024xf32>
    %cst_11 = arith.constant 1.000000e+00 : f32
    %18 = vector.broadcast %cst_11 : f32 to vector<8x1024xf32>
    %19 = arith.addf %18, %17 : vector<8x1024xf32>
    %20 = arith.divf %18, %19 : vector<8x1024xf32>
    %c0_12 = arith.constant 0 : index
    %c0_13 = arith.constant 0 : index
    %21 = vector.load %arg6[%c0_12, %c0_13] : memref<1x8xf32, #tpu.memory_space<vmem>>, vector<1x8xf32>
    %cst_14 = arith.constant dense<0.000000e+00> : vector<1x1024xf32>
    %22 = tpu.matmul %21, %20, %cst_14 {dimension_numbers = #tpu.dot_dimension_numbers<[1], [0], [0], [1], [0, 0, 1, 1], [], []>} : vector<1x8xf32>, vector<8x1024xf32>, vector<1x1024xf32> -> vector<1x1024xf32>
    %c0_15 = arith.constant 0 : index
    %c0_16 = arith.constant 0 : index
    %23 = vector.load %arg7[%c0_15, %c0_16] : memref<1x1xf32, #tpu.memory_space<vmem>>, vector<1x1xf32>
    %24 = vector.broadcast %23 : vector<1x1xf32> to vector<1x1024xf32>
    %25 = arith.addf %22, %24 : vector<1x1024xf32>
    %26 = arith.negf %25 : vector<1x1024xf32>
    %27 = math.exp %26 : vector<1x1024xf32>
    %cst_17 = arith.constant 1.000000e+00 : f32
    %28 = vector.broadcast %cst_17 : f32 to vector<1x1024xf32>
    %29 = arith.addf %28, %27 : vector<1x1024xf32>
    %30 = arith.divf %28, %29 : vector<1x1024xf32>
    %c0_18 = arith.constant 0 : index
    %c0_19 = arith.constant 0 : index
    %31 = vector.load %arg8[%c0_18, %c0_19] : memref<1x1024xf32, #tpu.memory_space<vmem>>, vector<1x1024xf32>
    tpu.vector_store %arg8[%c0_18, %c0_19], %30 {strides = array<i32>} : memref<1x1024xf32, #tpu.memory_space<vmem>>, vector<1x1024xf32>,
    return
  }
  func.func @transform_0(%arg0: i32) -> (i32, i32) {
    %c0_i32 = arith.constant 0 : i32
    %c0_i32_0 = arith.constant 0 : i32
    return %c0_i32, %arg0 : i32, i32
  }
  func.func @transform_1(%arg0: i32) -> (i32, i32) {
    %c0_i32 = arith.constant 0 : i32
    %c0_i32_0 = arith.constant 0 : i32
    %c0_i32_1 = arith.constant 0 : i32
    return %c0_i32, %c0_i32_0 : i32, i32
  }
  func.func @transform_2(%arg0: i32) -> (i32, i32) {
    %c0_i32 = arith.constant 0 : i32
    %c0_i32_0 = arith.constant 0 : i32
    %c0_i32_1 = arith.constant 0 : i32
    return %c0_i32, %c0_i32_0 : i32, i32
  }
  func.func @transform_3(%arg0: i32) -> (i32, i32) {
    %c0_i32 = arith.constant 0 : i32
    %c0_i32_0 = arith.constant 0 : i32
    %c0_i32_1 = arith.constant 0 : i32
    return %c0_i32, %c0_i32_0 : i32, i32
  }
  func.func @transform_4(%arg0: i32) -> (i32, i32) {
    %c0_i32 = arith.constant 0 : i32
    %c0_i32_0 = arith.constant 0 : i32
    %c0_i32_1 = arith.constant 0 : i32
    return %c0_i32, %c0_i32_0 : i32, i32
  }
  func.func @transform_5(%arg0: i32) -> (i32, i32) {
    %c0_i32 = arith.constant 0 : i32
    %c0_i32_0 = arith.constant 0 : i32
    %c0_i32_1 = arith.constant 0 : i32
    return %c0_i32, %c0_i32_0 : i32, i32
  }
  func.func @transform_6(%arg0: i32) -> (i32, i32) {
    %c0_i32 = arith.constant 0 : i32
    %c0_i32_0 = arith.constant 0 : i32
    %c0_i32_1 = arith.constant 0 : i32
    return %c0_i32, %c0_i32_0 : i32, i32
  }
  func.func @transform_7(%arg0: i32) -> (i32, i32) {
    %c0_i32 = arith.constant 0 : i32
    %c0_i32_0 = arith.constant 0 : i32
    return %c0_i32, %arg0 : i32, i32
  }
}

</mosaic_0001>

<bundles_post_ra>
// kernel: red_forward.1
= control target key start
LH: loop header
LB: loop body
LE: loop exit
PB: predicated region body
PF: predicated region fallthrough
CT: control target
= control target key end

     0   :  { %v2271_v3 = vmov 0.0   ;;  %v2272_v9 = vmov 0   ;;  %vm116_vm0 = vcmask 261120   ;;  %vm984_vm1 = vcmask 523264   ;;  %s2807_s0 = inlined_call_operand.vmem [shape: f32[32,1024], index: 0, kind: input, shape index: {}]   ;;  %s2808_s6 = inlined_call_operand.<no memory space> [shape: f32[1,1], index: 6, kind: input, shape index: {}]   ;;  %s2809_s1 = inlined_call_operand.vmem [shape: f32[64,32], index: 1, kind: input, shape index: {}]   ;;  %s2810_s2 = inlined_call_operand.vmem [shape: f32[64,1], index: 2, kind: input, shape index: {}]   ;;  %s2811_s4 = inlined_call_operand.vmem [shape: f32[8,1], index: 4, kind: input, shape index: {}]   ;;  %s2812_s3 = inlined_call_operand.vmem [shape: f32[8,64], index: 3, kind: input, shape index: {}]   ;;  %s2813_s5 = inlined_call_operand.vmem [shape: f32[1,8], index: 5, kind: input, shape index: {}]   ;;  %s2814_s7 = inlined_call_operand.vmem [shape: f32[1,1024], index: 7, kind: output, shape index: {}]  }
   0x1   :  { %v37_v0 = vld [vmem:[%s2807_s0 + $0x8] sm:$0xff]  ;;  %v39_v2 = vld [vmem:[%s2807_s0 + $0x18] sm:$0xff]  ;;  %205 = vmatprep.mubr.f32.mxu0 %v2271_v3  ;;  %318 = vmatprep.mubr.f32.mxu1 %v2271_v3  ;;  %v12_v4 = vstv %s2808_s6  ;;  %v36_v7 = vld [vmem:[%s2807_s0] sm:$0xff]  ;;  %vm1331_vm2 = vcmask 64512  }
   0x2   :  { %v45_v1 = vld [vmem:[%s2807_s0 + $0x48] sm:$0xff]  ;;  %v47_v6 = vld [vmem:[%s2807_s0 + $0x58] sm:$0xff]  ;;  %v44_v8 = vld [vmem:[%s2807_s0 + $0x40] sm:$0xff]  ;;  %1949 = vset.pattern.permute.xlu0 %v2272_v9  ;;  %1950 = vset.pattern.permute.xlu1 %v2272_v9  ;;  %13 = vst [vmem:[#allocation2] sm:$0x1] %v12_v4 }
   0x3   :  { %v1850_v5 = vpack.c.bf16 %v45_v1, %v37_v0  ;;  %v1858_v10 = vpack.c.bf16 %v47_v6, %v39_v2  ;;  %v1852_v11 = vpack.c.bf16 %v44_v8, %v36_v7  ;;  %v38_v12 = vld [vmem:[%s2807_s0 + $0x10] sm:$0xff]  ;;  %v53_v14 = vld [vmem:[%s2807_s0 + $0x88] sm:$0xff]  ;;  %v55_v17 = vld [vmem:[%s2807_s0 + $0x98] sm:$0xff] }
   0x4   :  { %v46_v13 = vld [vmem:[%s2807_s0 + $0x50] sm:$0xff]  ;;  %v61_v16 = vld [vmem:[%s2807_s0 + $0xc8] sm:$0xff]  ;;  %v63_v18 = vld [vmem:[%s2807_s0 + $0xd8] sm:$0xff] }
   0x5   :  { %1851 = vmatprep.subr.bf16.mxu0 %v1850_v5  ;;  %v1860_v15 = vpack.c.bf16 %v46_v13, %v38_v12  ;;  %1859 = vmatprep.subr.bf16.mxu1 %v1858_v10  ;;  %v1854_v19 = vpack.c.bf16 %v61_v16, %v53_v14  ;;  %v1862_v20 = vpack.c.bf16 %v63_v18, %v55_v17  ;;  %v52_v21 = vld [vmem:[%s2807_s0 + $0x80] sm:$0xff]  ;;  %v54_v23 = vld [vmem:[%s2807_s0 + $0x90] sm:$0xff]  ;;  %v41_v26 = vld [vmem:[%s2807_s0 + $0x28] sm:$0xff] }
   0x6   :  { %1853 = vmatpush1.bf16.msra.mxu0 %v1852_v11  ;;  %v60_v22 = vld [vmem:[%s2807_s0 + $0xc0] sm:$0xff]  ;;  %v62_v25 = vld [vmem:[%s2807_s0 + $0xd0] sm:$0xff]  ;;  %v49_v28 = vld [vmem:[%s2807_s0 + $0x68] sm:$0xff] }
   0x7   :  { %1861 = vmatpush1.bf16.msra.mxu1 %v1860_v15  ;;  %v1856_v24 = vpack.c.bf16 %v60_v22, %v52_v21  ;;  %1855 = vmatprep.subr.bf16.mxu0 %v1854_v19  ;;  %v1864_v27 = vpack.c.bf16 %v62_v25, %v54_v23  ;;  %v43_v29 = vld [vmem:[%s2807_s0 + $0x38] sm:$0xff]  ;;  %v1866_v31 = vpack.c.bf16 %v49_v28, %v41_v26  ;;  %v40_v33 = vld [vmem:[%s2807_s0 + $0x20] sm:$0xff]  ;;  %v42_v35 = vld [vmem:[%s2807_s0 + $0x30] sm:$0xff] }
   0x8   :  { %1863 = vmatprep.subr.bf16.mxu1 %v1862_v20  ;;  %v51_v30 = vld [vmem:[%s2807_s0 + $0x78] sm:$0xff]  ;;  %v48_v34 = vld [vmem:[%s2807_s0 + $0x60] sm:$0xff]  ;;  %v50_v37 = vld [vmem:[%s2807_s0 + $0x70] sm:$0xff] }
   0x9   :  { %v1874_v32 = vpack.c.bf16 %v51_v30, %v43_v29  ;;  %v2391_v36 = vld [vmem:[%s2809_s1] sm:$0xff]  ;;  %v1868_v38 = vpack.c.bf16 %v48_v34, %v40_v33  ;;  %v57_v39 = vld [vmem:[%s2807_s0 + $0xa8] sm:$0xff]  ;;  %v1876_v40 = vpack.c.bf16 %v50_v37, %v42_v35  ;;  %v59_v42 = vld [vmem:[%s2807_s0 + $0xb8] sm:$0xff] }
   0xa   :  { %1857 = vmatpush1.bf16.msra.mxu0 %v1856_v24  ;;  %v65_v41 = vld [vmem:[%s2807_s0 + $0xe8] sm:$0xff]  ;;  %v67_v43 = vld [vmem:[%s2807_s0 + $0xf8] sm:$0xff]  ;;  %v56_v46 = vld [vmem:[%s2807_s0 + $0xa0] sm:$0xff] }
   0xb   :  { %1865 = vmatpush1.bf16.msra.mxu1 %v1864_v27  ;;  %1867 = vmatprep.subr.bf16.mxu0 %v1866_v31  ;;  %v1870_v44 = vpack.c.bf16 %v65_v41, %v57_v39  ;;  %v1878_v45 = vpack.c.bf16 %v67_v43, %v59_v42  ;;  %v64_v47 = vld [vmem:[%s2807_s0 + $0xe0] sm:$0xff]  ;;  %v58_v48 = vld [vmem:[%s2807_s0 + $0xb0] sm:$0xff]  ;;  %v2425_v49 = vld [vmem:[%s2809_s1 + $0x8] sm:$0xff] }
   0xc   :  { %1875 = vmatprep.subr.bf16.mxu1 %v1874_v32  ;;  %v66_v50 = vld [vmem:[%s2807_s0 + $0xf0] sm:$0xff]  ;;  %v1872_v51 = vpack.c.bf16 %v64_v47, %v56_v46  ;;  %v68_v53 = vld [vmem:[%s2810_s2] sm:$0xff]  ;;  %v69_v56 = vld [vmem:[%s2810_s2 + $0x8] sm:$0xff] }
   0xd   :  { %1730 = vmatmul.mubr.msk.f32.vlgmr.msra.gmra.mrb[0].mxu0 %vm116_vm0, %v2391_v36  ;;  %v1880_v52 = vpack.c.bf16 %v66_v50, %v58_v48  ;;  %v30_v54 = vld [vmem:[%s2809_s1 + $0x10] sm:$0xff]  ;;  %78 = vperm.xlu0 %1949, %v68_v53   ;;  %v31_v57 = vld [vmem:[%s2809_s1 + $0x18] sm:$0xff]  ;;  %v72_v59 = vld [vmem:[%s2810_s2 + $0x20] sm:$0xff] }
   0xe   :  { %1738 = vmatmul.mubr.msk.f32.vlgmr.msra.gmra.mrb[0].mxu1 %vm116_vm0, %v2391_v36  ;;  %211 = vmatprep.mubr.f32.mxu0 %v2271_v3  ;;  %v70_v55 = vld [vmem:[%s2810_s2 + $0x10] sm:$0xff]  ;;  %v71_v58 = vld [vmem:[%s2810_s2 + $0x18] sm:$0xff]  ;;  %v32_v60 = vld [vmem:[%s2809_s1 + $0x20] sm:$0xff] }
   0xf   :  { %324 = vmatprep.mubr.f32.mxu1 %v2271_v3  ;;  %1869 = vmatpush1.bf16.msra.mxu0 %v1868_v38  ;;  %v73_v61 = vld [vmem:[%s2810_s2 + $0x28] sm:$0xff]  ;;  %v74_v62 = vld [vmem:[%s2810_s2 + $0x30] sm:$0xff]  ;;  %v75_v0 = vld [vmem:[%s2810_s2 + $0x38] sm:$0xff] }
  0x10   :  { %1877 = vmatpush1.bf16.msra.mxu1 %v1876_v40  ;;  %1871 = vmatprep.subr.bf16.mxu0 %v1870_v44  ;;  %v33_v63 = vld [vmem:[%s2809_s1 + $0x28] sm:$0xff]  ;;  %v978_v1 = vld [vmem:[%s2811_s4] sm:$0xff]  ;;  %v34_v2 = vld [vmem:[%s2809_s1 + $0x30] sm:$0xff] }
  0x11   :  { %1731 = vmatmul.mubr.msk.f32.gmra.mrb[2].mxu0 %vm116_vm0, %v2425_v49  ;;  %1879 = vmatprep.subr.bf16.mxu1 %v1878_v45  ;;  %v1321_v4 = vld [vmem:[#allocation2] sm:$0x1]  ;;  %v35_v5 = vld [vmem:[%s2809_s1 + $0x38] sm:$0xff] }
  0x12   :  { %1739 = vmatmul.mubr.msk.f32.gmra.mrb[2].mxu1 %vm116_vm0, %v2425_v49  ;;  %217 = vmatprep.mubr.f32.mxu0 %v2271_v3 }
  0x13   :  { %330 = vmatprep.mubr.f32.mxu1 %v2271_v3  ;;  %1873 = vmatpush1.bf16.msra.mxu0 %v1872_v51 }
  0x14   :  { %1881 = vmatpush1.bf16.msra.mxu1 %v1880_v52  ;;  %88 = vperm.xlu1 %1950, %v70_v55  }
  0x15   :  { %1732 = vmatmul.mubr.msk.f32.gmra.mrb[4].mxu0 %vm116_vm0, %v30_v54  ;;  %83 = vperm.xlu0 %1949, %v69_v56  }
  0x16   :  { %1740 = vmatmul.mubr.msk.f32.gmra.mrb[4].mxu1 %vm116_vm0, %v30_v54  ;;  %223 = vmatprep.mubr.f32.mxu0 %v2271_v3 }
  0x17   :  { %336 = vmatprep.mubr.f32.mxu1 %v2271_v3 }
  0x18   :  { %93 = vperm.xlu1 %1950, %v71_v58  }
  0x19   :  { %1733 = vmatmul.mubr.msk.f32.gmra.mrb[6].mxu0 %vm116_vm0, %v31_v57  ;;  %98 = vperm.xlu0 %1949, %v72_v59  }
  0x1a   :  { %1741 = vmatmul.mubr.msk.f32.gmra.mrb[6].mxu1 %vm116_vm0, %v31_v57  ;;  %229 = vmatprep.mubr.f32.mxu0 %v2271_v3 }
  0x1b   :  { %342 = vmatprep.mubr.f32.mxu1 %v2271_v3 }
  0x1c   :  { %103 = vperm.xlu1 %1950, %v73_v61  }
  0x1d   :  { %1734 = vmatmul.mubr.msk.f32.gmra.mrb[8].mxu0 %vm116_vm0, %v32_v60  ;;  %108 = vperm.xlu0 %1949, %v74_v62  }
  0x1e   :  { %1742 = vmatmul.mubr.msk.f32.gmra.mrb[8].mxu1 %vm116_vm0, %v32_v60  ;;  %235 = vmatprep.mubr.f32.mxu0 %v2271_v3 }
  0x1f   :  { %348 = vmatprep.mubr.f32.mxu1 %v2271_v3 }
  0x20   :  { %113 = vperm.xlu1 %1950, %v75_v0  }
  0x21   :  { %1735 = vmatmul.mubr.msk.f32.gmra.mrb[10].mxu0 %vm116_vm0, %v33_v63  ;;  %981 = vperm.xlu0 %1949, %v978_v1  }
  0x22   :  { %1743 = vmatmul.mubr.msk.f32.gmra.mrb[10].mxu1 %vm116_vm0, %v33_v63  ;;  %241 = vmatprep.mubr.f32.mxu0 %v2271_v3 }
  0x23   :  { %354 = vmatprep.mubr.f32.mxu1 %v2271_v3 }
  0x24   :  { %1324 = vperm.xlu1 %1950, %v1321_v4  }
  0x25   :  { %1736 = vmatmul.mubr.msk.f32.gmra.mrb[12].mxu0 %vm116_vm0, %v34_v2 }
  0x26   :  { %1744 = vmatmul.mubr.msk.f32.gmra.mrb[12].mxu1 %vm116_vm0, %v34_v2  ;;  %247 = vmatprep.mubr.f32.mxu0 %v2271_v3 }
  0x27   :  { %360 = vmatprep.mubr.f32.mxu1 %v2271_v3 }
  0x29   :  { %1737 = vmatmul.mubr.msk.f32.gmra.mrb[14].mxu0 %vm116_vm0, %v35_v5 }
  0x2a   :  { %1745 = vmatmul.mubr.msk.f32.gmra.mrb[14].mxu1 %vm116_vm0, %v35_v5  ;;  %431 = vmatprep.mubr.f32.mxu0 %v2271_v3 }
  0x2b   :  { %544 = vmatprep.mubr.f32.mxu1 %v2271_v3 }
  0x2d   :  { %1746 = vmatmul.mubr.msk.f32.vlgmr.msra.gmra.mrb[16].mxu0 %vm116_vm0, %v2391_v36 }
  0x2e   :  { %1754 = vmatmul.mubr.msk.f32.vlgmr.msra.gmra.mrb[16].mxu1 %vm116_vm0, %v2391_v36  ;;  %437 = vmatprep.mubr.f32.mxu0 %v2271_v3 }
  0x2f   :  { %550 = vmatprep.mubr.f32.mxu1 %v2271_v3 }
  0x31   :  { %1747 = vmatmul.mubr.msk.f32.gmra.mrb[18].mxu0 %vm116_vm0, %v2425_v49 }
  0x32   :  { %1755 = vmatmul.mubr.msk.f32.gmra.mrb[18].mxu1 %vm116_vm0, %v2425_v49  ;;  %443 = vmatprep.mubr.f32.mxu0 %v2271_v3 }
  0x33   :  { %556 = vmatprep.mubr.f32.mxu1 %v2271_v3 }
  0x35   :  { %1748 = vmatmul.mubr.msk.f32.gmra.mrb[20].mxu0 %vm116_vm0, %v30_v54 }
  0x36   :  { %1756 = vmatmul.mubr.msk.f32.gmra.mrb[20].mxu1 %vm116_vm0, %v30_v54  ;;  %449 = vmatprep.mubr.f32.mxu0 %v2271_v3 }
  0x37   :  { %562 = vmatprep.mubr.f32.mxu1 %v2271_v3 }
  0x39   :  { %1749 = vmatmul.mubr.msk.f32.gmra.mrb[22].mxu0 %vm116_vm0, %v31_v57 }
  0x3a   :  { %1757 = vmatmul.mubr.msk.f32.gmra.mrb[22].mxu1 %vm116_vm0, %v31_v57  ;;  %455 = vmatprep.mubr.f32.mxu0 %v2271_v3 }
  0x3b   :  { %568 = vmatprep.mubr.f32.mxu1 %v2271_v3 }
  0x3d   :  { %1750 = vmatmul.mubr.msk.f32.gmra.mrb[24].mxu0 %vm116_vm0, %v32_v60 }
  0x3e   :  { %1758 = vmatmul.mubr.msk.f32.gmra.mrb[24].mxu1 %vm116_vm0, %v32_v60  ;;  %461 = vmatprep.mubr.f32.mxu0 %v2271_v3 }
  0x3f   :  { %574 = vmatprep.mubr.f32.mxu1 %v2271_v3 }
  0x41   :  { %1751 = vmatmul.mubr.msk.f32.gmra.mrb[26].mxu0 %vm116_vm0, %v33_v63 }
  0x42   :  { %1759 = vmatmul.mubr.msk.f32.gmra.mrb[26].mxu1 %vm116_vm0, %v33_v63  ;;  %467 = vmatprep.mubr.f32.mxu0 %v2271_v3 }
  0x43   :  { %580 = vmatprep.mubr.f32.mxu1 %v2271_v3 }
  0x45   :  { %1752 = vmatmul.mubr.msk.f32.gmra.mrb[28].mxu0 %vm116_vm0, %v34_v2 }
  0x46   :  { %1760 = vmatmul.mubr.msk.f32.gmra.mrb[28].mxu1 %vm116_vm0, %v34_v2  ;;  %473 = vmatprep.mubr.f32.mxu0 %v2271_v3 }
  0x47   :  { %586 = vmatprep.mubr.f32.mxu1 %v2271_v3 }
  0x49   :  { %1753 = vmatmul.mubr.msk.f32.gmra.mrb[30].mxu0 %vm116_vm0, %v35_v5 }
  0x4a   :  { %1761 = vmatmul.mubr.msk.f32.gmra.mrb[30].mxu1 %vm116_vm0, %v35_v5  ;;  %1052 = vmatprep.mubr.f32.mxu0 %v2271_v3 }
  0x4b   :  { %1123 = vmatprep.mubr.f32.mxu1 %v2271_v3 }
  0x8c   :  { %v2542_v6 = vpop.permute.xlu0 %78 }
  0x93   :  { %v2550_v20 = vpop.permute.xlu1 %88 }
  0x94   :  { %v2547_v14 = vpop.permute.xlu0 %83 }
  0x97   :  { %v2559_v40 = vpop.permute.xlu1 %93 }
  0xe0   :  { %v207_v7 = vpop.f32.mrb[0].mxu0 }
  0xe1   :  { %v208_v8 = vadd.f32 %v207_v7, %v2542_v6  ;;  %v320_v9 = vpop.f32.mrb[0].mxu1  ;;  %v209_v10 = vpop.f32.mrb[1].mxu0 }
  0xe2   :  { %v321_v11 = vadd.f32 %v320_v9, %v2542_v6  ;;  %v210_v12 = vadd.f32 %v209_v10, %v2542_v6  ;;  %v322_v13 = vpop.f32.mrb[1].mxu1 }
  0xe3   :  { %v1762_v15 = vmul.f32 -1.442695, %v208_v8  ;;  %v323_v16 = vadd.f32 %v322_v13, %v2542_v6 }
  0xe4   :  { %v1764_v17 = vmul.f32 -1.442695, %v321_v11  ;;  %v1763_v18 = vmul.f32 -1.442695, %v210_v12  ;;  %v213_v19 = vpop.f32.mrb[2].mxu0 }
  0xe5   :  { %1951 = vpow2.f32 %v1762_v15  ;;  %v1765_v21 = vmul.f32 -1.442695, %v323_v16  ;;  %v214_v22 = vadd.f32 %v213_v19, %v2547_v14  ;;  %v326_v23 = vpop.f32.mrb[2].mxu1  ;;  %v215_v24 = vpop.f32.mrb[3].mxu0 }
  0xe6   :  { %1953 = vpow2.f32 %v1764_v17  ;;  %v327_v25 = vadd.f32 %v326_v23, %v2547_v14  ;;  %v216_v26 = vadd.f32 %v215_v24, %v2547_v14  ;;  %v328_v27 = vpop.f32.mrb[3].mxu1  ;;  %v2563_v16 = vpop.permute.xlu0 %98 }
  0xe7   :  { %1955 = vpow2.f32 %v1763_v18  ;;  %v1770_v28 = vmul.f32 -1.442695, %v214_v22  ;;  %v329_v29 = vadd.f32 %v328_v27, %v2547_v14 }
  0xe8   :  { %1957 = vpow2.f32 %v1765_v21  ;;  %v1772_v30 = vmul.f32 -1.442695, %v327_v25  ;;  %v1771_v31 = vmul.f32 -1.442695, %v216_v26  ;;  %v219_v32 = vpop.f32.mrb[4].mxu0 }
  0xe9   :  { %1959 = vpow2.f32 %v1770_v28  ;;  %v1773_v33 = vmul.f32 -1.442695, %v329_v29  ;;  %v220_v34 = vadd.f32 %v219_v32, %v2550_v20  ;;  %v332_v35 = vpop.f32.mrb[4].mxu1  ;;  %v221_v36 = vpop.f32.mrb[5].mxu0 }
  0xea   :  { %1961 = vpow2.f32 %v1772_v30  ;;  %v333_v37 = vadd.f32 %v332_v35, %v2550_v20  ;;  %v222_v38 = vadd.f32 %v221_v36, %v2550_v20  ;;  %v334_v39 = vpop.f32.mrb[5].mxu1  ;;  %v2573_v35 = vpop.permute.xlu1 %103 }
  0xeb   :  { %1963 = vpow2.f32 %v1771_v31  ;;  %v1778_v41 = vmul.f32 -1.442695, %v220_v34  ;;  %v335_v42 = vadd.f32 %v334_v39, %v2550_v20 }
  0xec   :  { %1965 = vpow2.f32 %v1773_v33  ;;  %v1780_v43 = vmul.f32 -1.442695, %v333_v37  ;;  %v1779_v44 = vmul.f32 -1.442695, %v222_v38  ;;  %v225_v45 = vpop.f32.mrb[6].mxu0 }
  0xed   :  { %1967 = vpow2.f32 %v1778_v41  ;;  %v1781_v46 = vmul.f32 -1.442695, %v335_v42  ;;  %v226_v47 = vadd.f32 %v225_v45, %v2559_v40  ;;  %v338_v48 = vpop.f32.mrb[6].mxu1  ;;  %v227_v49 = vpop.f32.mrb[7].mxu0 }
  0xee   :  { %1969 = vpow2.f32 %v1780_v43  ;;  %v340_v50 = vpop.f32.mrb[7].mxu1  ;;  %v339_v17 = vadd.f32 %v338_v48, %v2559_v40  ;;  %v228_v21 = vadd.f32 %v227_v49, %v2559_v40 }
  0xef   :  { %v1952_v51 = vpop.eup %1951  ;;  %1971 = vpow2.f32 %v1779_v44  ;;  %v1786_v52 = vmul.f32 -1.442695, %v226_v47  ;;  %v341_v25 = vadd.f32 %v340_v50, %v2559_v40 }
  0xf0   :  { %v1954_v53 = vpop.eup %1953  ;;  %v785_v54 = vadd.f32 1.0, %v1952_v51  ;;  %1973 = vpow2.f32 %v1781_v46  ;;  %v231_v55 = vpop.f32.mrb[8].mxu0  ;;  %v1788_v34 = vmul.f32 -1.442695, %v339_v17  ;;  %v1787_v39 = vmul.f32 -1.442695, %v228_v21 }
  0xf1   :  { %v1956_v56 = vpop.eup %1955  ;;  %v787_v57 = vadd.f32 1.0, %v1954_v53  ;;  %1975 = vpow2.f32 %v1786_v52  ;;  %v344_v58 = vpop.f32.mrb[8].mxu1  ;;  %v232_v30 = vadd.f32 %v231_v55, %v2563_v16  ;;  %v1789_v44 = vmul.f32 -1.442695, %v341_v25 }
  0xf2   :  { %v233_v59 = vpop.f32.mrb[9].mxu0  ;;  %v1958_v60 = vpop.eup %1957  ;;  %1977 = vrcp.f32 %v785_v54  ;;  %v786_v61 = vadd.f32 1.0, %v1956_v56  ;;  %v345_v36 = vadd.f32 %v344_v58, %v2563_v16 }
  0xf3   :  { %v346_v62 = vpop.f32.mrb[9].mxu1  ;;  %v1960_v63 = vpop.eup %1959  ;;  %1979 = vrcp.f32 %v787_v57  ;;  %v788_v0 = vadd.f32 1.0, %v1958_v60  ;;  %v234_v41 = vadd.f32 %v233_v59, %v2563_v16  ;;  %v1794_v49 = vmul.f32 -1.442695, %v232_v30 }
  0xf4   :  { %v1962_v1 = vpop.eup %1961  ;;  %1981 = vrcp.f32 %v786_v61  ;;  %v793_v2 = vadd.f32 1.0, %v1960_v63  ;;  %v237_v4 = vpop.f32.mrb[10].mxu0  ;;  %v347_v45 = vadd.f32 %v346_v62, %v2563_v16  ;;  %v1796_v54 = vmul.f32 -1.442695, %v345_v36 }
  0xf5   :  { %v1964_v5 = vpop.eup %1963  ;;  %1983 = vrcp.f32 %v788_v0  ;;  %v795_v7 = vadd.f32 1.0, %v1962_v1  ;;  %v350_v8 = vpop.f32.mrb[10].mxu1  ;;  %v238_v50 = vadd.f32 %v237_v4, %v2573_v35  ;;  %v1795_v57 = vmul.f32 -1.442695, %v234_v41 }
  0xf6   :  { %v239_v9 = vpop.f32.mrb[11].mxu0  ;;  %v1966_v10 = vpop.eup %1965  ;;  %1985 = vrcp.f32 %v793_v2  ;;  %v794_v11 = vadd.f32 1.0, %v1964_v5  ;;  %v351_v55 = vadd.f32 %v350_v8, %v2573_v35  ;;  %v1797_v61 = vmul.f32 -1.442695, %v347_v45 }
  0xf7   :  { %v352_v12 = vpop.f32.mrb[11].mxu1  ;;  %v1968_v13 = vpop.eup %1967  ;;  %1987 = vrcp.f32 %v795_v7  ;;  %v796_v15 = vadd.f32 1.0, %v1966_v10  ;;  %v240_v58 = vadd.f32 %v239_v9, %v2573_v35  ;;  %v1802_v4 = vmul.f32 -1.442695, %v238_v50 }
  0xf8   :  { %v1970_v18 = vpop.eup %1969  ;;  %1989 = vrcp.f32 %v794_v11  ;;  %v801_v19 = vadd.f32 1.0, %v1968_v13  ;;  %v243_v22 = vpop.f32.mrb[12].mxu0  ;;  %v353_v62 = vadd.f32 %v352_v12, %v2573_v35  ;;  %v1804_v10 = vmul.f32 -1.442695, %v351_v55 }
  0xf9   :  { %v1972_v23 = vpop.eup %1971  ;;  %1991 = vrcp.f32 %v796_v15  ;;  %v803_v24 = vadd.f32 1.0, %v1970_v18  ;;  %v356_v26 = vpop.f32.mrb[12].mxu1  ;;  %v1803_v15 = vmul.f32 -1.442695, %v240_v58 }
  0xfa   :  { %v2568_v27 = vpop.f32.mrb[13].mxu0  ;;  %v1974_v28 = vpop.eup %1973  ;;  %1993 = vrcp.f32 %v801_v19  ;;  %v802_v29 = vadd.f32 1.0, %v1972_v23  ;;  %v1805_v21 = vmul.f32 -1.442695, %v353_v62 }
  0xfb   :  { %v2571_v31 = vpop.f32.mrb[13].mxu1  ;;  %v1976_v32 = vpop.eup %1975  ;;  %1995 = vrcp.f32 %v803_v24  ;;  %v804_v33 = vadd.f32 1.0, %v1974_v28 }
  0xfc   :  { %v1978_v37 = vpop.eup %1977  ;;  %1997 = vrcp.f32 %v802_v29  ;;  %v809_v38 = vadd.f32 1.0, %v1976_v32  ;;  %v2577_v42 = vpop.f32.mrb[14].mxu0 }
  0xfd   :  { %v1980_v43 = vpop.eup %1979  ;;  %1999 = vrcp.f32 %v804_v33  ;;  %v2580_v46 = vpop.f32.mrb[14].mxu1 }
  0xfe   :  { %v2582_v47 = vpop.f32.mrb[15].mxu0  ;;  %v1982_v48 = vpop.eup %1981  ;;  %2001 = vrcp.f32 %v809_v38 }
  0xff   :  { %v2585_v51 = vpop.f32.mrb[15].mxu1  ;;  %v1984_v52 = vpop.eup %1983  ;;  %2003 = vpow2.f32 %v1788_v34 }
 0x100   :  { %v2587_v53 = vpop.permute.xlu0 %108  ;;  %v1986_v56 = vpop.eup %1985  ;;  %2005 = vpow2.f32 %v1787_v39 }
 0x101   :  { %v2591_v59 = vpop.f32.mrb[16].mxu0  ;;  %v1988_v60 = vpop.eup %1987  ;;  %2007 = vpow2.f32 %v1789_v44  ;;  %v1884_v1 = vpack.c.bf16 %v1986_v56, %v1978_v37  ;;  %v244_v5 = vadd.f32 %v243_v22, %v2587_v53  ;;  %v357_v11 = vadd.f32 %v356_v26, %v2587_v53 }
 0x102   :  { %v2594_v63 = vpop.f32.mrb[16].mxu1  ;;  %v2596_v0 = vpop.f32.mrb[17].mxu0  ;;  %2009 = vpow2.f32 %v1794_v49  ;;  %v1900_v8 = vpack.c.bf16 %v1988_v60, %v1980_v43 }
 0x103   :  { %v1990_v2 = vpop.eup %1989  ;;  %v2599_v7 = vpop.f32.mrb[17].mxu1  ;;  %2011 = vpow2.f32 %v1796_v54  ;;  %v1810_v25 = vmul.f32 -1.442695, %v244_v5  ;;  %v1812_v29 = vmul.f32 -1.442695, %v357_v11 }
 0x104   :  { %v1992_v9 = vpop.eup %1991  ;;  %v1882_v13 = vpack.c.bf16 %v1990_v2, %v1982_v48  ;;  %2013 = vpow2.f32 %v1795_v57  ;;  %v2604_v17 = vpop.f32.mrb[18].mxu0 }
 0x105   :  { %v2602_v12 = vpop.eup %1993  ;;  %v1898_v18 = vpack.c.bf16 %v1992_v9, %v1984_v52  ;;  %2015 = vpow2.f32 %v1797_v61  ;;  %v2608_v22 = vpop.f32.mrb[18].mxu1 }
 0x106   :  { %v2606_v19 = vpop.eup %1995  ;;  %1883 = vmatprep.subr.bf16.mxu0 %v1882_v13  ;;  %v2610_v23 = vpop.f32.mrb[19].mxu0  ;;  %2017 = vpow2.f32 %v1802_v4 }
 0x107   :  { %v2612_v24 = vpop.eup %1997  ;;  %1899 = vmatprep.subr.bf16.mxu1 %v1898_v18  ;;  %v2614_v26 = vpop.f32.mrb[19].mxu1  ;;  %1885 = vmatpush1.bf16.msra.mxu0 %v1884_v1  ;;  %2019 = vpow2.f32 %v1804_v10  ;;  %v246_v10 = vadd.f32 %v2568_v27, %v2587_v53 }
 0x108   :  { %v2616_v28 = vpop.eup %1999  ;;  %1901 = vmatpush1.bf16.msra.mxu1 %v1900_v8  ;;  %2021 = vpow2.f32 %v1803_v15  ;;  %v2620_v32 = vpop.f32.mrb[20].mxu0 }
 0x109   :  { %v2618_v30 = vpop.eup %2001  ;;  %2023 = vpow2.f32 %v1805_v21  ;;  %v558_v34 = vpop.f32.mrb[20].mxu1  ;;  %v359_v21 = vadd.f32 %v2571_v31, %v2587_v53  ;;  %v1811_v31 = vmul.f32 -1.442695, %v246_v10  ;;  %v547_v10 = vadd.f32 %v2594_v63, %v2542_v6 }
 0x10a   :  { %v2004_v33 = vpop.eup %2003  ;;  %v2622_v36 = vpop.f32.mrb[21].mxu0  ;;  %v1888_v37 = vpack.c.bf16 %v2618_v30, %v2602_v12  ;;  %2025 = vpow2.f32 %v1810_v25  ;;  %v2627_v41 = vadd.f32 %v558_v34, %v2550_v20  ;;  %v549_v63 = vadd.f32 %v2599_v7, %v2542_v6 }
 0x10b   :  { %v2006_v38 = vpop.eup %2005  ;;  %v811_v39 = vadd.f32 1.0, %v2004_v33  ;;  %v2629_v43 = vpop.f32.mrb[21].mxu1  ;;  %2027 = vpow2.f32 %v1812_v29 }
 0x10c   :  { %v2008_v44 = vpop.eup %2007  ;;  %v810_v45 = vadd.f32 1.0, %v2006_v38  ;;  %v2631_v50 = vpop.f32.mrb[22].mxu0  ;;  %v1769_v30 = vmul.f32 -1.442695, %v549_v63 }
 0x10d   :  { %v2010_v48 = vpop.eup %2009  ;;  %2029 = vrcp.f32 %v811_v39  ;;  %v812_v49 = vadd.f32 1.0, %v2008_v44  ;;  %v2633_v55 = vpop.f32.mrb[22].mxu1 }
 0x10e   :  { %v2012_v52 = vpop.eup %2011  ;;  %2031 = vrcp.f32 %v810_v45  ;;  %v817_v54 = vadd.f32 1.0, %v2010_v48  ;;  %v2635_v56 = vpop.f32.mrb[23].mxu0 }
 0x10f   :  { %v2014_v57 = vpop.eup %2013  ;;  %2033 = vrcp.f32 %v812_v49  ;;  %v819_v58 = vadd.f32 1.0, %v2012_v52  ;;  %v2637_v60 = vpop.f32.mrb[23].mxu1 }
 0x110   :  { %v2016_v61 = vpop.eup %2015  ;;  %2035 = vrcp.f32 %v817_v54  ;;  %v818_v62 = vadd.f32 1.0, %v2014_v57  ;;  %v2639_v4 = vpop.permute.xlu1 %113 }
 0x111   :  { %v2018_v1 = vpop.eup %2017  ;;  %2037 = vrcp.f32 %v819_v58  ;;  %v820_v2 = vadd.f32 1.0, %v2016_v61  ;;  %v2641_v5 = vpop.f32.mrb[24].mxu0  ;;  %v250_v34 = vadd.f32 %v2577_v42, %v2639_v4  ;;  %v363_v39 = vadd.f32 %v2580_v46, %v2639_v4 }
 0x112   :  { %v2020_v8 = vpop.eup %2019  ;;  %2039 = vrcp.f32 %v818_v62  ;;  %v825_v9 = vadd.f32 1.0, %v2018_v1  ;;  %v2645_v11 = vpop.f32.mrb[24].mxu1  ;;  %v252_v49 = vadd.f32 %v2582_v47, %v2639_v4  ;;  %v1813_v58 = vmul.f32 -1.442695, %v359_v21 }
 0x113   :  { %v2647_v13 = vpop.f32.mrb[25].mxu0  ;;  %v2022_v15 = vpop.eup %2021  ;;  %2041 = vrcp.f32 %v820_v2  ;;  %v827_v18 = vadd.f32 1.0, %v2020_v8  ;;  %v365_v46 = vadd.f32 %v2585_v51, %v2639_v4  ;;  %v1818_v1 = vmul.f32 -1.442695, %v250_v34 }
 0x114   :  { %v2651_v25 = vpop.f32.mrb[25].mxu1  ;;  %v2024_v29 = vpop.eup %2023  ;;  %2043 = vrcp.f32 %v825_v9  ;;  %v826_v33 = vadd.f32 1.0, %v2022_v15  ;;  %v434_v2 = vadd.f32 %v2591_v59, %v2542_v6  ;;  %v1820_v9 = vmul.f32 -1.442695, %v363_v39 }
 0x115   :  { %v2026_v38 = vpop.eup %2025  ;;  %2045 = vrcp.f32 %v827_v18  ;;  %v828_v27 = vadd.f32 1.0, %v2024_v29  ;;  %v2657_v44 = vpop.f32.mrb[26].mxu0  ;;  %v1819_v21 = vmul.f32 -1.442695, %v252_v49  ;;  %v436_v29 = vadd.f32 %v2596_v0, %v2542_v6 }
 0x116   :  { %v2028_v45 = vpop.eup %2027  ;;  %2047 = vrcp.f32 %v826_v33  ;;  %v833_v48 = vadd.f32 1.0, %v2026_v38  ;;  %v2661_v52 = vpop.f32.mrb[26].mxu1  ;;  %v1821_v38 = vmul.f32 -1.442695, %v365_v46  ;;  %v1766_v39 = vmul.f32 -1.442695, %v434_v2 }
 0x117   :  { %v2663_v54 = vpop.f32.mrb[27].mxu0  ;;  %v2030_v42 = vpop.eup %2029  ;;  %2049 = vrcp.f32 %v828_v27  ;;  %v835_v57 = vadd.f32 1.0, %v2028_v45  ;;  %v440_v0 = vadd.f32 %v2604_v17, %v2547_v14  ;;  %v1768_v45 = vmul.f32 -1.442695, %v547_v10 }
 0x118   :  { %v2667_v61 = vpop.f32.mrb[27].mxu1  ;;  %v2032_v62 = vpop.eup %2031  ;;  %2051 = vrcp.f32 %v833_v48  ;;  %v1904_v47 = vpack.c.bf16 %v2030_v42, %v2606_v19  ;;  %v553_v6 = vadd.f32 %v2608_v22, %v2547_v14  ;;  %v442_v17 = vadd.f32 %v2610_v23, %v2547_v14 }
 0x119   :  { %v2034_v8 = vpop.eup %2033  ;;  %2053 = vrcp.f32 %v835_v57  ;;  %v1886_v15 = vpack.c.bf16 %v2032_v62, %v2612_v24  ;;  %v2675_v18 = vpop.f32.mrb[28].mxu0 }
 0x11a   :  { %v2036_v51 = vpop.eup %2035  ;;  %2055 = vpow2.f32 %v1811_v31  ;;  %v1902_v59 = vpack.c.bf16 %v2034_v8, %v2616_v28  ;;  %v2680_v33 = vpop.f32.mrb[28].mxu1  ;;  %v1767_v31 = vmul.f32 -1.442695, %v436_v29  ;;  %v1775_v23 = vmul.f32 -1.442695, %v442_v17 }
 0x11b   :  { %v2682_v19 = vpop.f32.mrb[29].mxu0  ;;  %v2038_v34 = vpop.eup %2037  ;;  %2057 = vpow2.f32 %v1813_v58  ;;  %1887 = vmatprep.subr.bf16.mxu0 %v1886_v15  ;;  %v1774_v58 = vmul.f32 -1.442695, %v440_v0  ;;  %v555_v17 = vadd.f32 %v2614_v26, %v2547_v14  ;;  %v561_v14 = vadd.f32 %v2629_v43, %v2550_v20 }
 0x11c   :  { %v2686_v24 = vpop.f32.mrb[29].mxu1  ;;  %v2040_v27 = vpop.eup %2039  ;;  %2059 = vpow2.f32 %v1818_v1  ;;  %1903 = vmatprep.subr.bf16.mxu1 %v1902_v59  ;;  %1889 = vmatpush1.bf16.msra.mxu0 %v1888_v37  ;;  %v1776_v1 = vmul.f32 -1.442695, %v553_v6 }
 0x11d   :  { %v2042_v28 = vpop.eup %2041  ;;  %2061 = vpow2.f32 %v1820_v9  ;;  %1905 = vmatpush1.bf16.msra.mxu1 %v1904_v47  ;;  %v2695_v7 = vpop.f32.mrb[30].mxu0 }
 0x11e   :  { %v2044_v48 = vpop.eup %2043  ;;  %2063 = vpow2.f32 %v1819_v21  ;;  %v2699_v49 = vpop.f32.mrb[30].mxu1 }
 0x11f   :  { %v2701_v42 = vpop.f32.mrb[31].mxu0  ;;  %v2046_v12 = vpop.eup %2045  ;;  %2065 = vpow2.f32 %v1821_v38  ;;  %v1892_v37 = vpack.c.bf16 %v2044_v48, %v2036_v51 }
 0x120   :  { %v2703_v57 = vpop.f32.mrb[31].mxu1  ;;  %v2048_v22 = vpop.eup %2047  ;;  %2067 = vpow2.f32 %v1766_v39  ;;  %v1908_v46 = vpack.c.bf16 %v2046_v12, %v2038_v34 }
 0x121   :  { %v2050_v62 = vpop.eup %2049  ;;  %2069 = vpow2.f32 %v1768_v45  ;;  %v1890_v2 = vpack.c.bf16 %v2048_v22, %v2040_v27 }
 0x122   :  { %v2705_v47 = vpop.eup %2051  ;;  %2071 = vpow2.f32 %v1767_v31  ;;  %v1906_v8 = vpack.c.bf16 %v2050_v62, %v2042_v28 }
 0x123   :  { %v2707_v9 = vpop.eup %2053  ;;  %2073 = vpow2.f32 %v1769_v30  ;;  %1891 = vmatprep.subr.bf16.mxu0 %v1890_v2 }
 0x124   :  { %v2056_v10 = vpop.eup %2055  ;;  %2075 = vpow2.f32 %v1774_v58  ;;  %1907 = vmatprep.subr.bf16.mxu1 %v1906_v8  ;;  %1893 = vmatpush1.bf16.msra.mxu0 %v1892_v37  ;;  %v446_v37 = vadd.f32 %v2620_v32, %v2550_v20  ;;  %v1777_v8 = vmul.f32 -1.442695, %v555_v17 }
 0x125   :  { %v2058_v15 = vpop.eup %2057  ;;  %v834_v51 = vadd.f32 1.0, %v2056_v10  ;;  %2077 = vpow2.f32 %v1776_v1  ;;  %1909 = vmatpush1.bf16.msra.mxu1 %v1908_v46  ;;  %v448_v1 = vadd.f32 %v2622_v36, %v2550_v20  ;;  %v565_v36 = vadd.f32 %v2633_v55, %v2559_v40 }
 0x126   :  { %v2060_v21 = vpop.eup %2059  ;;  %v836_v29 = vadd.f32 1.0, %v2058_v15  ;;  %2079 = vpow2.f32 %v1775_v23  ;;  %v1782_v32 = vmul.f32 -1.442695, %v446_v37  ;;  %v452_v15 = vadd.f32 %v2631_v50, %v2559_v40 }
 0x127   :  { %v2062_v59 = vpop.eup %2061  ;;  %2081 = vrcp.f32 %v834_v51  ;;  %v841_v34 = vadd.f32 1.0, %v2060_v21  ;;  %v1784_v21 = vmul.f32 -1.442695, %v2627_v41  ;;  %v454_v20 = vadd.f32 %v2635_v56, %v2559_v40 }
 0x128   :  { %v2064_v38 = vpop.eup %2063  ;;  %2083 = vrcp.f32 %v836_v29  ;;  %v843_v63 = vadd.f32 1.0, %v2062_v59  ;;  %v1783_v59 = vmul.f32 -1.442695, %v448_v1  ;;  %v1790_v41 = vmul.f32 -1.442695, %v452_v15 }
 0x129   :  { %v2066_v27 = vpop.eup %2065  ;;  %2085 = vrcp.f32 %v841_v34  ;;  %v842_v39 = vadd.f32 1.0, %v2064_v38  ;;  %v1785_v34 = vmul.f32 -1.442695, %v561_v14  ;;  %v567_v38 = vadd.f32 %v2637_v60, %v2559_v40 }
 0x12a   :  { %v2068_v0 = vpop.eup %2067  ;;  %2087 = vrcp.f32 %v843_v63  ;;  %v844_v28 = vadd.f32 1.0, %v2066_v27  ;;  %v458_v55 = vadd.f32 %v2641_v5, %v2563_v16  ;;  %v571_v56 = vadd.f32 %v2645_v11, %v2563_v16  ;;  %v2741_v11 = vld [vmem:[%s2812_s3] sm:$0xff] }
 0x12b   :  { %v2070_v45 = vpop.eup %2069  ;;  %2089 = vrcp.f32 %v842_v39  ;;  %v789_v6 = vadd.f32 1.0, %v2068_v0  ;;  %v1792_v0 = vmul.f32 -1.442695, %v565_v36  ;;  %v1791_v40 = vmul.f32 -1.442695, %v454_v20 }
 0x12c   :  { %v2072_v48 = vpop.eup %2071  ;;  %2091 = vrcp.f32 %v844_v28  ;;  %v791_v31 = vadd.f32 1.0, %v2070_v45  ;;  %v460_v60 = vadd.f32 %v2647_v13, %v2563_v16  ;;  %v1793_v5 = vmul.f32 -1.442695, %v567_v38 }
 0x12d   :  { %v2074_v12 = vpop.eup %2073  ;;  %2093 = vrcp.f32 %v789_v6  ;;  %v790_v30 = vadd.f32 1.0, %v2072_v48  ;;  %v1800_v17 = vmul.f32 -1.442695, %v571_v56  ;;  %v579_v56 = vadd.f32 %v2667_v61, %v2573_v35 }
 0x12e   :  { %v2076_v22 = vpop.eup %2075  ;;  %2095 = vrcp.f32 %v791_v31  ;;  %v792_v58 = vadd.f32 1.0, %v2074_v12  ;;  %v1798_v31 = vmul.f32 -1.442695, %v458_v55 }
 0x12f   :  { %v2078_v46 = vpop.eup %2077  ;;  %2097 = vrcp.f32 %v790_v30  ;;  %v797_v62 = vadd.f32 1.0, %v2076_v22 }
 0x130   :  { %v2080_v2 = vpop.eup %2079  ;;  %2099 = vrcp.f32 %v792_v58  ;;  %v799_v23 = vadd.f32 1.0, %v2078_v46 }
 0x131   :  { %v2082_v26 = vpop.eup %2081  ;;  %2101 = vrcp.f32 %v797_v62  ;;  %v798_v10 = vadd.f32 1.0, %v2080_v2 }
 0x132   :  { %v2084_v51 = vpop.eup %2083  ;;  %2103 = vrcp.f32 %v799_v23 }
 0x133   :  { %v2086_v29 = vpop.eup %2085  ;;  %2105 = vrcp.f32 %v798_v10 }
 0x134   :  { %v2088_v43 = vpop.eup %2087  ;;  %2107 = vpow2.f32 %v1777_v8  ;;  %v1896_v50 = vpack.c.bf16 %v2086_v29, %v2705_v47 }
 0x135   :  { %v2090_v63 = vpop.eup %2089  ;;  %2109 = vpow2.f32 %v1782_v32  ;;  %v1912_v27 = vpack.c.bf16 %v2088_v43, %v2707_v9  ;;  %v573_v9 = vadd.f32 %v2651_v25, %v2563_v16  ;;  %v1799_v16 = vmul.f32 -1.442695, %v460_v60 }
 0x136   :  { %v2092_v39 = vpop.eup %2091  ;;  %2111 = vpow2.f32 %v1784_v21  ;;  %v1894_v28 = vpack.c.bf16 %v2090_v63, %v2082_v26  ;;  %v577_v63 = vadd.f32 %v2661_v52, %v2573_v35 }
 0x137   :  { %v2094_v45 = vpop.eup %2093  ;;  %2113 = vpow2.f32 %v1783_v59  ;;  %v1910_v47 = vpack.c.bf16 %v2092_v39, %v2084_v51  ;;  %v1801_v30 = vmul.f32 -1.442695, %v573_v9  ;;  %v472_v9 = vadd.f32 %v2682_v19, %v2587_v53 }
 0x138   :  { %v2734_v6 = vpop.eup %2095  ;;  %2115 = vpow2.f32 %v1785_v34  ;;  %1895 = vmatprep.subr.bf16.mxu0 %v1894_v28  ;;  %v464_v34 = vadd.f32 %v2657_v44, %v2573_v35  ;;  %v1808_v52 = vmul.f32 -1.442695, %v577_v63  ;;  %v589_v19 = vadd.f32 %v2699_v49, %v2639_v4 }
 0x139   :  { %v2098_v48 = vpop.eup %2097  ;;  %2117 = vpow2.f32 %v1790_v41  ;;  %1911 = vmatprep.subr.bf16.mxu1 %v1910_v47  ;;  %1897 = vmatpush1.bf16.msra.mxu0 %v1896_v50  ;;  %v583_v47 = vadd.f32 %v2680_v33, %v2587_v53  ;;  %v476_v33 = vadd.f32 %v2695_v7, %v2639_v4 }
 0x13a   :  { %v2743_v13 = vpop.eup %2099  ;;  %2119 = vpow2.f32 %v1792_v0  ;;  %1913 = vmatpush1.bf16.msra.mxu1 %v1912_v27  ;;  %v466_v27 = vadd.f32 %v2663_v54, %v2573_v35 }
 0x13b   :  { %v2102_v12 = vpop.eup %2101  ;;  %2121 = vpow2.f32 %v1791_v40  ;;  %v470_v40 = vadd.f32 %v2675_v18, %v2587_v53  ;;  %v585_v18 = vadd.f32 %v2686_v24, %v2587_v53  ;;  %v1815_v53 = vmul.f32 -1.442695, %v472_v9 }
 0x13c   :  { %v2745_v25 = vpop.eup %2103  ;;  %2123 = vpow2.f32 %v1793_v5  ;;  %1826 = vmatmul.mubr.msk.f32.vlgmr.msra.gmra.mrb[32].mxu0 %vm984_vm1, %v2741_v11  ;;  %v1916_v37 = vpack.c.bf16 %v2102_v12, %v2094_v45  ;;  %v1806_v45 = vmul.f32 -1.442695, %v464_v34  ;;  %v1807_v54 = vmul.f32 -1.442695, %v466_v27 }
 0x13d   :  { %v2106_v22 = vpop.eup %2105  ;;  %2125 = vpow2.f32 %v1798_v31  ;;  %1827 = vmatmul.mubr.msk.f32.vlgmr.msra.gmra.mrb[32].mxu1 %vm984_vm1, %v2741_v11  ;;  %v1932_v58 = vpack.c.bf16 %v2745_v25, %v2734_v6  ;;  %1194 = vmatprep.mubr.f32.mxu0 %v2271_v3  ;;  %v478_v24 = vadd.f32 %v2701_v42, %v2639_v4  ;;  %v1817_v7 = vmul.f32 -1.442695, %v585_v18 }
 0x13e   :  { %v2108_v46 = vpop.eup %2107  ;;  %2127 = vpow2.f32 %v1800_v17  ;;  %v1914_v62 = vpack.c.bf16 %v2106_v22, %v2098_v48  ;;  %1265 = vmatprep.mubr.f32.mxu1 %v2271_v3  ;;  %v1809_v48 = vmul.f32 -1.442695, %v579_v56  ;;  %v1814_v17 = vmul.f32 -1.442695, %v470_v40 }
 0x13f   :  { %v2110_v1 = vpop.eup %2109  ;;  %v800_v2 = vadd.f32 1.0, %v2108_v46  ;;  %2129 = vpow2.f32 %v1799_v16  ;;  %v1816_v16 = vmul.f32 -1.442695, %v583_v47  ;;  %v1822_v49 = vmul.f32 -1.442695, %v476_v33 }
 0x140   :  { %v2112_v23 = vpop.eup %2111  ;;  %v805_v8 = vadd.f32 1.0, %v2110_v1  ;;  %2131 = vpow2.f32 %v1801_v30  ;;  %1915 = vmatprep.subr.bf16.mxu0 %v1914_v62  ;;  %v1824_v6 = vmul.f32 -1.442695, %v589_v19 }
 0x141   :  { %v2114_v14 = vpop.eup %2113  ;;  %2133 = vrcp.f32 %v800_v2  ;;  %v807_v26 = vadd.f32 1.0, %v2112_v23  ;;  %1917 = vmatpush1.bf16.msra.mxu0 %v1916_v37  ;;  %v591_v37 = vadd.f32 %v2703_v57, %v2639_v4 }
 0x142   :  { %v2116_v10 = vpop.eup %2115  ;;  %2135 = vrcp.f32 %v805_v8  ;;  %v806_v32 = vadd.f32 1.0, %v2114_v14 }
 0x143   :  { %v2118_v15 = vpop.eup %2117  ;;  %2137 = vrcp.f32 %v807_v26  ;;  %v808_v51 = vadd.f32 1.0, %v2116_v10  ;;  %v1825_v42 = vmul.f32 -1.442695, %v591_v37 }
 0x144   :  { %v2120_v21 = vpop.eup %2119  ;;  %2139 = vrcp.f32 %v806_v32  ;;  %v813_v36 = vadd.f32 1.0, %v2118_v15 }
 0x145   :  { %v2122_v29 = vpop.eup %2121  ;;  %2141 = vrcp.f32 %v808_v51  ;;  %v815_v59 = vadd.f32 1.0, %v2120_v21 }
 0x146   :  { %v2124_v20 = vpop.eup %2123  ;;  %2143 = vrcp.f32 %v813_v36  ;;  %v814_v43 = vadd.f32 1.0, %v2122_v29 }
 0x147   :  { %v2126_v38 = vpop.eup %2125  ;;  %2145 = vrcp.f32 %v815_v59  ;;  %v816_v50 = vadd.f32 1.0, %v2124_v20 }
 0x148   :  { %v2128_v41 = vpop.eup %2127  ;;  %2147 = vrcp.f32 %v814_v43  ;;  %v821_v55 = vadd.f32 1.0, %v2126_v38 }
 0x149   :  { %v2130_v39 = vpop.eup %2129  ;;  %2149 = vrcp.f32 %v816_v50  ;;  %v823_v0 = vadd.f32 1.0, %v2128_v41 }
 0x14a   :  { %v2132_v28 = vpop.eup %2131  ;;  %v822_v44 = vadd.f32 1.0, %v2130_v39  ;;  %2151 = vrcp.f32 %v821_v55 }
 0x14b   :  { %v2134_v60 = vpop.eup %2133  ;;  %2153 = vrcp.f32 %v823_v0  ;;  %v824_v4 = vadd.f32 1.0, %v2132_v28 }
 0x14c   :  { %v2136_v5 = vpop.eup %2135  ;;  %v1930_v35 = vpack.c.bf16 %v2134_v60, %v2743_v13  ;;  %2155 = vrcp.f32 %v822_v44 }
 0x14d   :  { %v2138_v61 = vpop.eup %2137  ;;  %2157 = vpow2.f32 %v1806_v45 }
 0x14e   :  { %v2140_v31 = vpop.eup %2139  ;;  %1931 = vmatprep.subr.bf16.mxu1 %v1930_v35  ;;  %2159 = vpow2.f32 %v1808_v52 }
 0x14f   :  { %v2142_v12 = vpop.eup %2141  ;;  %1933 = vmatpush1.bf16.msra.mxu1 %v1932_v58  ;;  %2161 = vpow2.f32 %v1807_v54  ;;  %v1823_v58 = vmul.f32 -1.442695, %v478_v24 }
 0x150   :  { %v2144_v13 = vpop.eup %2143  ;;  %2163 = vpow2.f32 %v1809_v48 }
 0x151   :  { %v2146_v30 = vpop.eup %2145  ;;  %v1920_v22 = vpack.c.bf16 %v2144_v13, %v2136_v5  ;;  %2165 = vpow2.f32 %v1814_v17 }
 0x152   :  { %v2148_v46 = vpop.eup %2147  ;;  %v1936_v62 = vpack.c.bf16 %v2146_v30, %v2138_v61  ;;  %2167 = vpow2.f32 %v1816_v16  ;;  %v982_v30 = vpop.permute.xlu0 %981 }
 0x153   :  { %v2150_v1 = vpop.eup %2149  ;;  %v1918_v25 = vpack.c.bf16 %v2148_v46, %v2140_v31  ;;  %2169 = vpow2.f32 %v1815_v53 }
 0x154   :  { %v1934_v2 = vpack.c.bf16 %v2150_v1, %v2142_v12  ;;  %v2783_v23 = vpop.eup %2151  ;;  %2171 = vpow2.f32 %v1817_v7 }
 0x155   :  { %1919 = vmatprep.subr.bf16.mxu0 %v1918_v25  ;;  %v2785_v8 = vpop.eup %2153  ;;  %2173 = vpow2.f32 %v1822_v49 }
 0x156   :  { %1935 = vmatprep.subr.bf16.mxu1 %v1934_v2  ;;  %1921 = vmatpush1.bf16.msra.mxu0 %v1920_v22  ;;  %v2156_v57 = vpop.eup %2155  ;;  %2175 = vpow2.f32 %v1824_v6 }
 0x157   :  { %1937 = vmatpush1.bf16.msra.mxu1 %v1936_v62  ;;  %v2158_v14 = vpop.eup %2157  ;;  %2177 = vpow2.f32 %v1823_v58 }
 0x158   :  { %v2160_v26 = vpop.eup %2159  ;;  %v829_v10 = vadd.f32 1.0, %v2158_v14  ;;  %2179 = vpow2.f32 %v1825_v42 }
 0x159   :  { %v2162_v32 = vpop.eup %2161  ;;  %2181 = vrcp.f32 %v824_v4  ;;  %v831_v15 = vadd.f32 1.0, %v2160_v26 }
 0x15a   :  { %v2164_v51 = vpop.eup %2163  ;;  %2183 = vrcp.f32 %v829_v10  ;;  %v830_v21 = vadd.f32 1.0, %v2162_v32 }
 0x15b   :  { %v2166_v36 = vpop.eup %2165  ;;  %2185 = vrcp.f32 %v831_v15  ;;  %v832_v29 = vadd.f32 1.0, %v2164_v51  ;;  %v1320_v51 = vld [vmem:[%s2813_s5] sm:$0x1] }
 0x15c   :  { %v2168_v59 = vpop.eup %2167  ;;  %2187 = vrcp.f32 %v830_v21  ;;  %v837_v20 = vadd.f32 1.0, %v2166_v36 }
 0x15d   :  { %v2170_v43 = vpop.eup %2169  ;;  %2189 = vrcp.f32 %v832_v29  ;;  %v839_v34 = vadd.f32 1.0, %v2168_v59 }
 0x15e   :  { %v2172_v38 = vpop.eup %2171  ;;  %2191 = vrcp.f32 %v837_v20  ;;  %v838_v50 = vadd.f32 1.0, %v2170_v43 }
 0x15f   :  { %v2174_v63 = vpop.eup %2173  ;;  %2193 = vrcp.f32 %v839_v34  ;;  %v840_v41 = vadd.f32 1.0, %v2172_v38 }
 0x160   :  { %v2176_v55 = vpop.eup %2175  ;;  %2195 = vrcp.f32 %v838_v50  ;;  %v845_v27 = vadd.f32 1.0, %v2174_v63 }
 0x161   :  { %v2178_v39 = vpop.eup %2177  ;;  %2197 = vrcp.f32 %v840_v41  ;;  %v847_v0 = vadd.f32 1.0, %v2176_v55 }
 0x162   :  { %v2180_v56 = vpop.eup %2179  ;;  %2199 = vrcp.f32 %v845_v27  ;;  %v846_v28 = vadd.f32 1.0, %v2178_v39 }
 0x163   :  { %v2182_v44 = vpop.eup %2181  ;;  %2201 = vrcp.f32 %v847_v0  ;;  %v848_v45 = vadd.f32 1.0, %v2180_v56 }
 0x164   :  { %v2184_v40 = vpop.eup %2183  ;;  %2203 = vrcp.f32 %v846_v28 }
 0x165   :  { %v2186_v60 = vpop.eup %2185  ;;  %2205 = vrcp.f32 %v848_v45  ;;  %v1924_v52 = vpack.c.bf16 %v2184_v40, %v2783_v23 }
 0x166   :  { %v2188_v47 = vpop.eup %2187  ;;  %v1940_v5 = vpack.c.bf16 %v2186_v60, %v2785_v8 }
 0x167   :  { %v2190_v54 = vpop.eup %2189  ;;  %v1922_v9 = vpack.c.bf16 %v2188_v47, %v2156_v57 }
 0x168   :  { %v2192_v35 = vpop.eup %2191  ;;  %v1938_v61 = vpack.c.bf16 %v2190_v54, %v2182_v44 }
 0x169   :  { %v2194_v48 = vpop.eup %2193  ;;  %1923 = vmatprep.subr.bf16.mxu0 %v1922_v9  ;;  %v1327_v9 = vlaneseq }
 0x16a   :  { %v2196_v18 = vpop.eup %2195  ;;  %1939 = vmatprep.subr.bf16.mxu1 %v1938_v61  ;;  %1925 = vmatpush1.bf16.msra.mxu0 %v1924_v52 }
 0x16b   :  { %v2198_v31 = vpop.eup %2197  ;;  %1941 = vmatpush1.bf16.msra.mxu1 %v1940_v5 }
 0x16c   :  { %v2200_v17 = vpop.eup %2199 }
 0x16d   :  { %v2202_v33 = vpop.eup %2201  ;;  %v1928_v12 = vpack.c.bf16 %v2200_v17, %v2192_v35  ;;  %v1328_v35 = vshrl.u32 %v1327_v9, 7 }
 0x16e   :  { %v2204_v16 = vpop.eup %2203  ;;  %v1944_v19 = vpack.c.bf16 %v2202_v33, %v2194_v48  ;;  %v1325_v48 = vpop.permute.xlu1 %1324 }
 0x16f   :  { %v2206_v13 = vpop.eup %2205  ;;  %v1926_v53 = vpack.c.bf16 %v2204_v16, %v2196_v18  ;;  %v1329_v61 = vsub.s32 0, %v1328_v35 }
 0x170   :  { %v1942_v24 = vpack.c.bf16 %v2206_v13, %v2198_v31 }
 0x171   :  { %1927 = vmatprep.subr.bf16.mxu0 %v1926_v53  ;;  %v1330_v18 = vrot.slane %v1325_v48, %v1329_v61 }
 0x172   :  { %1943 = vmatprep.subr.bf16.mxu1 %v1942_v24  ;;  %1929 = vmatpush1.bf16.msra.mxu0 %v1928_v12 }
 0x173   :  { %1945 = vmatpush1.bf16.msra.mxu1 %v1944_v19 }
 0x175   :  { %1828 = vmatmul.mubr.msk.f32.vlgmr.msra.gmra.mrb[34].mxu0 %vm984_vm1, %v2741_v11 }
 0x176   :  { %1829 = vmatmul.mubr.msk.f32.vlgmr.msra.gmra.mrb[34].mxu1 %vm984_vm1, %v2741_v11  ;;  %1399 = vmatprep.mubr.f32.mxu0 %v2271_v3 }
 0x177   :  { %1470 = vmatprep.mubr.f32.mxu1 %v2271_v3 }
 0x20f   :  { %v1054_v7 = vpop.f32.mrb[32].mxu0 }
 0x210   :  { %v1055_v37 = vadd.f32 %v1054_v7, %v982_v30  ;;  %v1125_v22 = vpop.f32.mrb[32].mxu1  ;;  %v1056_v46 = vpop.f32.mrb[33].mxu0 }
 0x211   :  { %v1126_v49 = vadd.f32 %v1125_v22, %v982_v30  ;;  %v1057_v62 = vadd.f32 %v1056_v46, %v982_v30  ;;  %v1127_v1 = vpop.f32.mrb[33].mxu1 }
 0x212   :  { %v1830_v6 = vmul.f32 -1.442695, %v1055_v37  ;;  %v1128_v25 = vadd.f32 %v1127_v1, %v982_v30 }
 0x213   :  { %v1832_v58 = vmul.f32 -1.442695, %v1126_v49  ;;  %v1831_v2 = vmul.f32 -1.442695, %v1057_v62 }
 0x214   :  { %2207 = vpow2.f32 %v1830_v6  ;;  %v1833_v23 = vmul.f32 -1.442695, %v1128_v25 }
 0x215   :  { %2209 = vpow2.f32 %v1832_v58 }
 0x216   :  { %2211 = vpow2.f32 %v1831_v2  ;;  %v2273_v2 = vmov 1966171168  }
 0x217   :  { %2213 = vpow2.f32 %v1833_v23  ;;  %v1680_v23 = vunpack.c.l.s4 %v2273_v2 }
 0x21e   :  { %v2208_v11 = vpop.eup %2207 }
 0x21f   :  { %v2210_v42 = vpop.eup %2209  ;;  %v1296_v8 = vadd.f32 1.0, %v2208_v11  ;;  %v1681_v11 = vunpack.c.0.s8 %v1680_v23 }
 0x220   :  { %v2212_v4 = vpop.eup %2211  ;;  %v1298_v14 = vadd.f32 1.0, %v2210_v42 }
 0x221   :  { %v2214_v57 = vpop.eup %2213  ;;  %v1297_v26 = vadd.f32 1.0, %v2212_v4  ;;  %2215 = vrcp.f32 %v1296_v8  ;;  %v1684_v4 = vsub.s32 %v1681_v11, %v1328_v35 }
 0x222   :  { %v1299_v10 = vadd.f32 1.0, %v2214_v57 }
 0x223   :  { %2217 = vrcp.f32 %v1297_v26 }
 0x224   :  { %2219 = vrcp.f32 %v1299_v10 }
 0x225   :  { %2221 = vrcp.f32 %v1298_v14 }
 0x22b   :  { %v2216_v32 = vpop.eup %2215 }
 0x22d   :  { %v2218_v15 = vpop.eup %2217 }
 0x22e   :  { %v2220_v21 = vpop.eup %2219  ;;  %1335 = vmatprep.subr.mxu0 %v2218_v15 }
 0x22f   :  { %v2222_v36 = vpop.eup %2221  ;;  %1406 = vmatprep.subr.mxu1 %v2220_v21  ;;  %1336 = vmatpush1.msra.mxu0 %v2216_v32 }
 0x230   :  { %1407 = vmatpush1.msra.mxu1 %v2222_v36  ;;  %1838 = vmatmul.mubr.msk.f32.vlgmr.msra.gmra.mrb[36].mxu0 %vm1331_vm2, %v1320_v51 }
 0x231   :  { %1839 = vmatmul.mubr.msk.f32.vlgmr.msra.gmra.mrb[36].mxu1 %vm1331_vm2, %v1320_v51  ;;  %1541 = vmatprep.mubr.f32.mxu0 %v2271_v3 }
 0x232   :  { %1612 = vmatprep.mubr.f32.mxu1 %v2271_v3 }
 0x248   :  { %v1196_v29 = vpop.f32.mrb[34].mxu0 }
 0x249   :  { %v1197_v59 = vadd.f32 %v1196_v29, %v982_v30  ;;  %v1267_v20 = vpop.f32.mrb[34].mxu1  ;;  %v1198_v43 = vpop.f32.mrb[35].mxu0 }
 0x24a   :  { %v1268_v34 = vadd.f32 %v1267_v20, %v982_v30  ;;  %v1199_v38 = vadd.f32 %v1198_v43, %v982_v30  ;;  %v1269_v50 = vpop.f32.mrb[35].mxu1 }
 0x24b   :  { %v1834_v63 = vmul.f32 -1.442695, %v1197_v59  ;;  %v1270_v41 = vadd.f32 %v1269_v50, %v982_v30 }
 0x24c   :  { %v1836_v55 = vmul.f32 -1.442695, %v1268_v34  ;;  %v1835_v27 = vmul.f32 -1.442695, %v1199_v38 }
 0x24d   :  { %2223 = vpow2.f32 %v1834_v63  ;;  %v1837_v39 = vmul.f32 -1.442695, %v1270_v41 }
 0x24e   :  { %2225 = vpow2.f32 %v1836_v55 }
 0x24f   :  { %2227 = vpow2.f32 %v1835_v27 }
 0x250   :  { %2229 = vpow2.f32 %v1837_v39 }
 0x257   :  { %v2224_v0 = vpop.eup %2223 }
 0x258   :  { %v2226_v56 = vpop.eup %2225  ;;  %v1300_v28 = vadd.f32 1.0, %v2224_v0 }
 0x259   :  { %v2228_v3 = vpop.eup %2227  ;;  %v1302_v45 = vadd.f32 1.0, %v2226_v56 }
 0x25a   :  { %v2230_v44 = vpop.eup %2229  ;;  %v1301_v40 = vadd.f32 1.0, %v2228_v3  ;;  %2231 = vrcp.f32 %v1300_v28 }
 0x25b   :  { %v1303_v60 = vadd.f32 1.0, %v2230_v44 }
 0x25c   :  { %2233 = vrcp.f32 %v1301_v40 }
 0x25d   :  { %2235 = vrcp.f32 %v1303_v60 }
 0x25e   :  { %2237 = vrcp.f32 %v1302_v45 }
 0x264   :  { %v2232_v52 = vpop.eup %2231 }
 0x266   :  { %v2234_v47 = vpop.eup %2233 }
 0x267   :  { %v2236_v5 = vpop.eup %2235  ;;  %1477 = vmatprep.subr.mxu0 %v2234_v47 }
 0x268   :  { %v2238_v54 = vpop.eup %2237  ;;  %1548 = vmatprep.subr.mxu1 %v2236_v5  ;;  %1478 = vmatpush1.msra.mxu0 %v2232_v52 }
 0x269   :  { %1549 = vmatpush1.msra.mxu1 %v2238_v54  ;;  %1840 = vmatmul.mubr.msk.f32.vlgmr.msra.gmra.mrb[38].mxu0 %vm1331_vm2, %v1320_v51 }
 0x26a   :  { %1841 = vmatmul.mubr.msk.f32.vlgmr.msra.gmra.mrb[38].mxu1 %vm1331_vm2, %v1320_v51 }
 0x303   :  { %v1401_v31 = vpop.f32.mrb[36].mxu0 }
 0x304   :  { %v1402_v17 = vadd.f32 %v1401_v31, %v1330_v18  ;;  %v1472_v33 = vpop.f32.mrb[36].mxu1  ;;  %v1403_v12 = vpop.f32.mrb[37].mxu0 }
 0x305   :  { %v1473_v16 = vadd.f32 %v1472_v33, %v1330_v18  ;;  %v1404_v19 = vadd.f32 %v1403_v12, %v1330_v18  ;;  %v1474_v13 = vpop.f32.mrb[37].mxu1 }
 0x306   :  { %v1842_v53 = vmul.f32 -1.442695, %v1402_v17  ;;  %v1475_v24 = vadd.f32 %v1474_v13, %v1330_v18 }
 0x307   :  { %v1844_v30 = vmul.f32 -1.442695, %v1473_v16  ;;  %v1843_v7 = vmul.f32 -1.442695, %v1404_v19 }
 0x308   :  { %2239 = vpow2.f32 %v1842_v53  ;;  %v1845_v37 = vmul.f32 -1.442695, %v1475_v24 }
 0x309   :  { %2241 = vpow2.f32 %v1844_v30 }
 0x30a   :  { %2243 = vpow2.f32 %v1843_v7 }
 0x30b   :  { %2245 = vpow2.f32 %v1845_v37 }
 0x312   :  { %v2240_v22 = vpop.eup %2239 }
 0x313   :  { %v2242_v46 = vpop.eup %2241  ;;  %v1643_v49 = vadd.f32 1.0, %v2240_v22 }
 0x314   :  { %v2244_v62 = vpop.eup %2243  ;;  %v1645_v1 = vadd.f32 1.0, %v2242_v46 }
 0x315   :  { %v2246_v6 = vpop.eup %2245  ;;  %2247 = vrcp.f32 %v1643_v49  ;;  %v1644_v25 = vadd.f32 1.0, %v2244_v62 }
 0x316   :  { %2249 = vrcp.f32 %v1645_v1  ;;  %v1646_v58 = vadd.f32 1.0, %v2246_v6 }
 0x317   :  { %2251 = vrcp.f32 %v1644_v25 }
 0x318   :  { %2253 = vrcp.f32 %v1646_v58 }
 0x31f   :  { %v2248_v42 = vpop.eup %2247 }
 0x320   :  { %v2250_v8 = vpop.eup %2249 }
 0x321   :  { %v2252_v57 = vpop.eup %2251 }
 0x322   :  { %v2254_v14 = vpop.eup %2253  ;;  %v1675_v26 = vcombine.low %v2248_v42, %v2252_v57 }
 0x323   :  { %v1676_v10 = vcombine.low %v2250_v8, %v2254_v14 }
 0x324   :  { %v1685_v32 = vrot.slane %v1675_v26, %v1684_v4 }
 0x325   :  { %v1692_v15 = vrot.slane %v1676_v10, %v1684_v4 }
 0x327   :  { %v1707_v51 = vcombine.low %v1685_v32, %v1692_v15 }
 0x329   :  { %v1715_v48 = vrot.slane %v1707_v51, %v1684_v4 }
 0x33c   :  { %v1543_v21 = vpop.f32.mrb[38].mxu0 }
 0x33d   :  { %v1544_v36 = vadd.f32 %v1543_v21, %v1330_v18  ;;  %v1614_v29 = vpop.f32.mrb[38].mxu1  ;;  %v1545_v59 = vpop.f32.mrb[39].mxu0 }
 0x33e   :  { %v1615_v20 = vadd.f32 %v1614_v29, %v1330_v18  ;;  %v1546_v43 = vadd.f32 %v1545_v59, %v1330_v18  ;;  %v1616_v34 = vpop.f32.mrb[39].mxu1 }
 0x33f   :  { %v1846_v38 = vmul.f32 -1.442695, %v1544_v36  ;;  %v1617_v50 = vadd.f32 %v1616_v34, %v1330_v18 }
 0x340   :  { %v1848_v63 = vmul.f32 -1.442695, %v1615_v20  ;;  %v1847_v41 = vmul.f32 -1.442695, %v1546_v43 }
 0x341   :  { %2255 = vpow2.f32 %v1846_v38  ;;  %v1849_v55 = vmul.f32 -1.442695, %v1617_v50 }
 0x342   :  { %2257 = vpow2.f32 %v1848_v63 }
 0x343   :  { %2259 = vpow2.f32 %v1847_v41 }
 0x344   :  { %2261 = vpow2.f32 %v1849_v55 }
 0x34b   :  { %v2256_v27 = vpop.eup %2255 }
 0x34c   :  { %v2258_v39 = vpop.eup %2257  ;;  %v1647_v0 = vadd.f32 1.0, %v2256_v27 }
 0x34d   :  { %v2260_v56 = vpop.eup %2259  ;;  %v1649_v28 = vadd.f32 1.0, %v2258_v39 }
 0x34e   :  { %v2262_v3 = vpop.eup %2261  ;;  %2263 = vrcp.f32 %v1647_v0  ;;  %v1648_v44 = vadd.f32 1.0, %v2260_v56 }
 0x34f   :  { %2265 = vrcp.f32 %v1649_v28  ;;  %v1650_v45 = vadd.f32 1.0, %v2262_v3 }
 0x350   :  { %2267 = vrcp.f32 %v1648_v44 }
 0x351   :  { %2269 = vrcp.f32 %v1650_v45 }
 0x358   :  { %v2264_v40 = vpop.eup %2263 }
 0x359   :  { %v2266_v60 = vpop.eup %2265 }
 0x35a   :  { %v2268_v52 = vpop.eup %2267 }
 0x35b   :  { %v2270_v47 = vpop.eup %2269  ;;  %v1677_v5 = vcombine.low %v2264_v40, %v2268_v52 }
 0x35c   :  { %v1678_v54 = vcombine.low %v2266_v60, %v2270_v47 }
 0x35d   :  { %v1699_v9 = vrot.slane %v1677_v5, %v1684_v4 }
 0x35e   :  { %v1706_v35 = vrot.slane %v1678_v54, %v1684_v4 }
 0x360   :  { %v1708_v61 = vcombine.low %v1699_v9, %v1706_v35 }
 0x362   :  { %v1722_v18 = vrot.slane %v1708_v61, %v1684_v4 }
 0x364   :  { %v1723_v31 = vcombine.low %v1715_v48, %v1722_v18 }
 0x366   :  { %1725 = vst [vmem:[%s2814_s7] sm:$0xff] %v1723_v31 }

</bundles_post_ra>
